<compile_context>
chip_gen: v5e
topology: v5e:2x2
jax: 0.10.0
libtpu: 0.0.40
codegen_flags: <defaults>
</compile_context>

<pallas_src>
import math

import jax
import jax.numpy as jnp
from jax import lax
from jax.experimental import pallas as pl
from jax.experimental.pallas import tpu as pltpu


def _round_up(x, m):
    return (x + m - 1) // m * m


# ---------------------------------------------------------------------------
# Parameter preparation (one-time, outside the per-call path).
# ---------------------------------------------------------------------------
def prepare_params(wq, bq, wk, bk, wv, bv):
    """Fold 1/sqrt(D) into the query projection once, at parameter setup, so
    neither Q nor the (S, S) score matrix is ever scaled elementwise and no
    weight-sized tensor is recomputed per forward call."""
    d = wq.shape[0]
    inv_scale = 1.0 / math.sqrt(d)
    wq_s = (wq.astype(jnp.float32) * inv_scale).astype(wq.dtype)
    bq_s = (bq.astype(jnp.float32) * inv_scale).astype(bq.dtype)
    return (wq_s, bq_s, wk, bk, wv, bv)


# ---------------------------------------------------------------------------
# 1) QKV projection:  (M, D) @ {Wq, Wk, Wv} + {bq, bk, bv}  ->  Q, K, V (M, D)
#    Grid (M/tm, D/tn): x block reused for all three matmuls; weights tiled
#    over their output columns (VMEM-safe on v7x); both axes "parallel".
# ---------------------------------------------------------------------------
def _proj_tiles(m, d, itemsize, budget_bytes=20 * 1024 * 1024):
    # Lane-aligned output-column tile (multiple of 128, or full D).
    if d % 512 == 0:
        tn = 512
    elif d % 256 == 0:
        tn = 256
    elif d % 128 == 0:
        tn = 128
    else:
        tn = d
    # Row tile: largest candidate whose double-buffered working set
    # (x block + 3 weight blocks + 3 output blocks) fits the budget.
    tm = 8
    for c in (512, 256, 128, 64, 32, 16, 8):
        if m % c:
            continue
        est = 2 * c * d * itemsize            # x, double-buffered
        est += 3 * 2 * d * tn * itemsize      # wq/wk/wv blocks
        est += 3 * 2 * c * tn * itemsize      # q/k/v output blocks
        if est <= budget_bytes:
            tm = c
            break
    return tm, tn


def _make_qkv_kernel(mm_dtype):
    def kernel(x_ref, wq_ref, wk_ref, wv_ref, bq_ref, bk_ref, bv_ref,
               q_ref, k_ref, v_ref):
        x = x_ref[...].astype(mm_dtype)       # no-op when dtypes already match

        def proj(w_ref, b_ref, o_ref):
            acc = jnp.dot(x, w_ref[...].astype(mm_dtype),
                          preferred_element_type=jnp.float32)
            o_ref[...] = (acc + b_ref[...]).astype(o_ref.dtype)

        proj(wq_ref, bq_ref, q_ref)
        proj(wk_ref, bk_ref, k_ref)
        proj(wv_ref, bv_ref, v_ref)

    return kernel


def _qkv_projection(x2d, wq, bq, wk, bk, wv, bv, mm_dtype):
    m, d = x2d.shape
    tm, tn = _proj_tiles(m, d, jnp.dtype(mm_dtype).itemsize)

    x_spec = pl.BlockSpec((tm, d), lambda i, j: (i, 0))
    w_spec = pl.BlockSpec((d, tn), lambda i, j: (0, j))
    b_spec = pl.BlockSpec((1, tn), lambda i, j: (0, j))
    o_spec = pl.BlockSpec((tm, tn), lambda i, j: (i, j))
    o_shape = jax.ShapeDtypeStruct((m, d), x2d.dtype)

    isz = x2d.dtype.itemsize
    cost = pl.CostEstimate(
        flops=2 * m * d * 3 * d,
        transcendentals=0,
        bytes_accessed=(m * d + 3 * d * d + 3 * d) * isz + 3 * m * d * isz)

    return pl.pallas_call(
        _make_qkv_kernel(mm_dtype),
        out_shape=(o_shape, o_shape, o_shape),
        grid_spec=pltpu.PrefetchScalarGridSpec(
            num_scalar_prefetch=0,
            grid=(m // tm, d // tn),
            in_specs=[x_spec, w_spec, w_spec, w_spec, b_spec, b_spec, b_spec],
            out_specs=(o_spec, o_spec, o_spec),
        ),
        compiler_params=pltpu.CompilerParams(
            dimension_semantics=("parallel", "parallel")),
        cost_estimate=cost,
    )(x2d, wq, wk, wv, bq, bk, bv)


# ---------------------------------------------------------------------------
# 2) Flash attention: online softmax over K tiles (scale pre-folded into Wq).
# ---------------------------------------------------------------------------
def _attn_seq_tile(s, d, itemsize, budget_bytes=20 * 1024 * 1024):
    """Pick the sequence tile (tq == tk) and the padded sequence length."""
    cands = (512, 256, 128, 64, 32, 16, 8)
    t_cap = 8
    for c in cands:
        # q/k/v blocks (double-buffered) + out (double-buffered) + f32 acc.
        est = c * d * (3 * 2 * itemsize + 2 * itemsize + 4) + c * 8
        if est <= budget_bytes:
            t_cap = c
            break
    for c in cands:                          # prefer a divisor of S: no padding
        if c <= t_cap and s % c == 0:
            return c, s
    t = min(t_cap, _round_up(max(s, 8), 8))  # otherwise pad (never up to 512
    return t, _round_up(s, t)                # for a tiny S)


def _pick_bb(b, s_pad, d, tq):
    """Rows of the batch processed per grid step.  Collapse batch only for
    tiny per-step tiles (amortize ~0.35us/step), but keep >= 2 programs on the
    parallel grid axes so v7x's second TensorCore has work."""
    if s_pad * d > 128 * 128:
        return 1
    for bb in range(b, 0, -1):
        if b % bb == 0 and ((b // bb) * (s_pad // tq) >= 2 or bb == 1):
            return bb
    return 1


def _make_flash_kernel(mm_dtype, s_actual, tk, need_mask):
    neg_inf = float("-inf")

    def kernel(q_ref, k_ref, v_ref, o_ref, m_ref, l_ref, acc_ref):
        ki = pl.program_id(2)

        q = q_ref[...].astype(mm_dtype)      # (bb, tq, D)
        k = k_ref[...].astype(mm_dtype)      # (bb, tk, D)
        v = v_ref[...].astype(mm_dtype)      # (bb, tk, D)

        # QK^T via contracting dims -- no explicit (XLU) transpose of K.
        s = jnp.einsum("bqd,bkd->bqk", q, k,
                       preferred_element_type=jnp.float32)   # (bb, tq, tk) f32
        if need_mask:
            kidx = ki * tk + lax.broadcasted_iota(jnp.int32, s.shape, 2)
            s = jnp.where(kidx < s_actual, s, neg_inf)

        s_max = s.max(axis=-1, keepdims=True)

        @pl.when(ki == 0)
        def _first_kv_tile():
            # Skip the alpha rescale of the f32 accumulator on the first step.
            p = jnp.exp(s - s_max)
            m_ref[...] = s_max
            l_ref[...] = p.sum(axis=-1, keepdims=True)
            acc_ref[...] = jnp.einsum("bqk,bkd->bqd", p.astype(mm_dtype), v,
                                      preferred_element_type=jnp.float32)

        @pl.when(ki != 0)
        def _later_kv_tiles():
            m_prev = m_ref[...]
            m_new = jnp.maximum(m_prev, s_max)
            alpha = jnp.exp(m_prev - m_new)
            p = jnp.exp(s - m_new)
            m_ref[...] = m_new
            l_ref[...] = alpha * l_ref[...] + p.sum(axis=-1, keepdims=True)
            acc_ref[...] = alpha * acc_ref[...] + jnp.einsum(
                "bqk,bkd->bqd", p.astype(mm_dtype), v,
                preferred_element_type=jnp.float32)

        @pl.when(ki == pl.num_programs(2) - 1)
        def _finalize():
            # Exact reciprocal: l is only (bb, tq, 1), so the cost is tiny.
            inv_l = pl.reciprocal(l_ref[...], approx=False)
            o_ref[...] = (acc_ref[...] * inv_l).astype(o_ref.dtype)

    return kernel


def _flash_attention(q, k, v, *, s_actual, tile, mm_dtype):
    b, s_pad, d = q.shape
    tq = tk = tile
    bb = _pick_bb(b, s_pad, d, tq)
    need_mask = s_pad != s_actual

    qo_spec = pl.BlockSpec((bb, tq, d), lambda bi, qi, ki: (bi, qi, 0))
    kv_spec = pl.BlockSpec((bb, tk, d), lambda bi, qi, ki: (bi, ki, 0))

    isz = q.dtype.itemsize
    cost = pl.CostEstimate(
        flops=4 * b * s_pad * s_pad * d,
        transcendentals=b * s_pad * s_pad,
        bytes_accessed=4 * b * s_pad * d * isz)

    return pl.pallas_call(
        _make_flash_kernel(mm_dtype, s_actual, tk, need_mask),
        out_shape=jax.ShapeDtypeStruct((b, s_pad, d), q.dtype),
        grid_spec=pltpu.PrefetchScalarGridSpec(
            num_scalar_prefetch=0,
            grid=(b // bb, s_pad // tq, s_pad // tk),
            in_specs=[qo_spec, kv_spec, kv_spec],
            out_specs=qo_spec,
            scratch_shapes=[
                pltpu.VMEM((bb, tq, 1), jnp.float32),   # running row max
                pltpu.VMEM((bb, tq, 1), jnp.float32),   # running denominator
                pltpu.VMEM((bb, tq, d), jnp.float32),   # output accumulator
            ],
        ),
        compiler_params=pltpu.CompilerParams(
            dimension_semantics=("parallel", "parallel", "arbitrary")),
        cost_estimate=cost,
    )(q, k, v)


# ---------------------------------------------------------------------------
# Module forward.
# ---------------------------------------------------------------------------
def self_attention(x, params, *, matmul_dtype=None):
    """x: (B, S, D); params from prepare_params().  Returns (B, S, D).

    matmul_dtype: optional dtype for MXU operands (e.g. jnp.bfloat16 for f32
    inputs on v5e/v6e/v7x); accumulation and softmax math stay f32."""
    wq, bq, wk, bk, wv, bv = params
    b, s, d = x.shape
    mm_dtype = jnp.dtype(matmul_dtype) if matmul_dtype is not None else x.dtype

    tile, s_pad = _attn_seq_tile(s, d, jnp.dtype(mm_dtype).itemsize)
    if s_pad != s:
        x = jnp.pad(x, ((0, 0), (0, s_pad - s), (0, 0)))

    # Fused QKV projection: three separate outputs, consumed directly below
    # (no slice_in_dim copies; the (M, D) -> (B, S, D) reshape is free).
    q, k, v = _qkv_projection(x.reshape(b * s_pad, d),
                              wq, bq, wk, bk, wv, bv, mm_dtype)
    q = q.reshape(b, s_pad, d)
    k = k.reshape(b, s_pad, d)
    v = v.reshape(b, s_pad, d)

    out = _flash_attention(q, k, v, s_actual=s, tile=tile, mm_dtype=mm_dtype)
    if s_pad != s:
        out = out[:, :s, :]
    return out


def _reference(x, wq, bq, wk, bk, wv, bv):
    q = x @ wq + bq
    k = x @ wk + bk
    v = x @ wv + bv
    s = jnp.einsum("bqd,bkd->bqk", q, k) / math.sqrt(x.shape[-1])
    p = jax.nn.softmax(s, axis=-1)
    return jnp.einsum("bqk,bkd->bqd", p, v)


if __name__ == "__main__":
    B, S, D = 2, 8, 32

    key = jax.random.PRNGKey(0)
    kx, kq, kbq, kk, kbk, kv, kbv = jax.random.split(key, 7)

    bound = 1.0 / math.sqrt(D)
    x = jax.random.normal(kx, (B, S, D), dtype=jnp.float32)
    wq = jax.random.uniform(kq, (D, D), jnp.float32, -bound, bound)
    bq = jax.random.uniform(kbq, (1, D), jnp.float32, -bound, bound)
    wk = jax.random.uniform(kk, (D, D), jnp.float32, -bound, bound)
    bk = jax.random.uniform(kbk, (1, D), jnp.float32, -bound, bound)
    wv = jax.random.uniform(kv, (D, D), jnp.float32, -bound, bound)
    bv = jax.random.uniform(kbv, (1, D), jnp.float32, -bound, bound)

    # One-time parameter prep (1/sqrt(D) folded into Wq/bq).
    params = prepare_params(wq, bq, wk, bk, wv, bv)
    ref = _reference(x, wq, bq, wk, bk, wv, bv)

    # f32 path (matches the PyTorch module's numerics).
    fwd = jax.jit(self_attention)
    out = jax.block_until_ready(fwd(x, params))
    assert out.shape == (B, S, D)
    assert jnp.allclose(out, ref, atol=2e-3, rtol=2e-3)

    # Non-divisible sequence length exercises the pad + in-kernel mask path.
    S_odd = 10
    x_odd = jax.random.normal(jax.random.PRNGKey(1), (B, S_odd, D), jnp.float32)
    out_odd = jax.block_until_ready(self_attention(x_odd, params))
    ref_odd = _reference(x_odd, wq, bq, wk, bk, wv, bv)
    assert out_odd.shape == (B, S_odd, D)
    assert jnp.allclose(out_odd, ref_odd, atol=2e-3, rtol=2e-3)

    # Optional bf16 MXU operands (f32 accumulate / f32 softmax) fast path.
    out_bf16 = jax.block_until_ready(
        self_attention(x, params, matmul_dtype=jnp.bfloat16))
    assert out_bf16.shape == (B, S, D)
    assert jnp.allclose(out_bf16, ref, atol=5e-2, rtol=5e-2)

    print("KERNEL_OK")
</pallas_src>

<mosaic_0001>
module attributes {stable_mosaic.version = 11 : i64} {
  func.func @kernel(%arg0: i32, %arg1: i32, %arg2: memref<16x32xf32, #tpu.memory_space<vmem>>, %arg3: memref<32x32xf32, #tpu.memory_space<vmem>>, %arg4: memref<32x32xf32, #tpu.memory_space<vmem>>, %arg5: memref<32x32xf32, #tpu.memory_space<vmem>>, %arg6: memref<1x32xf32, #tpu.memory_space<vmem>>, %arg7: memref<1x32xf32, #tpu.memory_space<vmem>>, %arg8: memref<1x32xf32, #tpu.memory_space<vmem>>, %arg9: memref<16x32xf32, #tpu.memory_space<vmem>>, %arg10: memref<16x32xf32, #tpu.memory_space<vmem>>, %arg11: memref<16x32xf32, #tpu.memory_space<vmem>>) attributes {dimension_semantics = [#tpu.dimension_semantics<parallel>, #tpu.dimension_semantics<parallel>], iteration_bounds = array<i64: 1, 1>, scalar_prefetch = 0 : i64, scratch_operands = 0 : i64, tpu.core_type = #tpu.core_type<tc>, window_params = [{transform_indices = @transform_0, window_bounds = array<i64: 16, 32>}, {transform_indices = @transform_1, window_bounds = array<i64: 32, 32>}, {transform_indices = @transform_2, window_bounds = array<i64: 32, 32>}, {transform_indices = @transform_3, window_bounds = array<i64: 32, 32>}, {transform_indices = @transform_4, window_bounds = array<i64: 1, 32>}, {transform_indices = @transform_5, window_bounds = array<i64: 1, 32>}, {transform_indices = @transform_6, window_bounds = array<i64: 1, 32>}, {transform_indices = @transform_7, window_bounds = array<i64: 16, 32>}, {transform_indices = @transform_8, window_bounds = array<i64: 16, 32>}, {transform_indices = @transform_9, window_bounds = array<i64: 16, 32>}]} {
    %c0 = arith.constant 0 : index
    %c0_0 = arith.constant 0 : index
    %0 = vector.load %arg2[%c0, %c0_0] : memref<16x32xf32, #tpu.memory_space<vmem>>, vector<16x32xf32>
    %c0_1 = arith.constant 0 : index
    %c0_2 = arith.constant 0 : index
    %1 = vector.load %arg3[%c0_1, %c0_2] : memref<32x32xf32, #tpu.memory_space<vmem>>, vector<32x32xf32>
    %cst = arith.constant dense<0.000000e+00> : vector<16x32xf32>
    %2 = tpu.matmul %0, %1, %cst {dimension_numbers = #tpu.dot_dimension_numbers<[1], [0], [0], [1], [0, 0, 1, 1], [], []>} : vector<16x32xf32>, vector<32x32xf32>, vector<16x32xf32> -> vector<16x32xf32>
    %c0_3 = arith.constant 0 : index
    %c0_4 = arith.constant 0 : index
    %3 = vector.load %arg6[%c0_3, %c0_4] : memref<1x32xf32, #tpu.memory_space<vmem>>, vector<1x32xf32>
    %4 = vector.broadcast %3 : vector<1x32xf32> to vector<16x32xf32>
    %5 = arith.addf %2, %4 : vector<16x32xf32>
    %c0_5 = arith.constant 0 : index
    %c0_6 = arith.constant 0 : index
    %6 = vector.load %arg9[%c0_5, %c0_6] : memref<16x32xf32, #tpu.memory_space<vmem>>, vector<16x32xf32>
    tpu.vector_store %arg9[%c0_5, %c0_6], %5 {strides = array<i32>} : memref<16x32xf32, #tpu.memory_space<vmem>>, vector<16x32xf32>,
    %c0_7 = arith.constant 0 : index
    %c0_8 = arith.constant 0 : index
    %7 = vector.load %arg4[%c0_7, %c0_8] : memref<32x32xf32, #tpu.memory_space<vmem>>, vector<32x32xf32>
    %cst_9 = arith.constant dense<0.000000e+00> : vector<16x32xf32>
    %8 = tpu.matmul %0, %7, %cst_9 {dimension_numbers = #tpu.dot_dimension_numbers<[1], [0], [0], [1], [0, 0, 1, 1], [], []>} : vector<16x32xf32>, vector<32x32xf32>, vector<16x32xf32> -> vector<16x32xf32>
    %c0_10 = arith.constant 0 : index
    %c0_11 = arith.constant 0 : index
    %9 = vector.load %arg7[%c0_10, %c0_11] : memref<1x32xf32, #tpu.memory_space<vmem>>, vector<1x32xf32>
    %10 = vector.broadcast %9 : vector<1x32xf32> to vector<16x32xf32>
    %11 = arith.addf %8, %10 : vector<16x32xf32>
    %c0_12 = arith.constant 0 : index
    %c0_13 = arith.constant 0 : index
    %12 = vector.load %arg10[%c0_12, %c0_13] : memref<16x32xf32, #tpu.memory_space<vmem>>, vector<16x32xf32>
    tpu.vector_store %arg10[%c0_12, %c0_13], %11 {strides = array<i32>} : memref<16x32xf32, #tpu.memory_space<vmem>>, vector<16x32xf32>,
    %c0_14 = arith.constant 0 : index
    %c0_15 = arith.constant 0 : index
    %13 = vector.load %arg5[%c0_14, %c0_15] : memref<32x32xf32, #tpu.memory_space<vmem>>, vector<32x32xf32>
    %cst_16 = arith.constant dense<0.000000e+00> : vector<16x32xf32>
    %14 = tpu.matmul %0, %13, %cst_16 {dimension_numbers = #tpu.dot_dimension_numbers<[1], [0], [0], [1], [0, 0, 1, 1], [], []>} : vector<16x32xf32>, vector<32x32xf32>, vector<16x32xf32> -> vector<16x32xf32>
    %c0_17 = arith.constant 0 : index
    %c0_18 = arith.constant 0 : index
    %15 = vector.load %arg8[%c0_17, %c0_18] : memref<1x32xf32, #tpu.memory_space<vmem>>, vector<1x32xf32>
    %16 = vector.broadcast %15 : vector<1x32xf32> to vector<16x32xf32>
    %17 = arith.addf %14, %16 : vector<16x32xf32>
    %c0_19 = arith.constant 0 : index
    %c0_20 = arith.constant 0 : index
    %18 = vector.load %arg11[%c0_19, %c0_20] : memref<16x32xf32, #tpu.memory_space<vmem>>, vector<16x32xf32>
    tpu.vector_store %arg11[%c0_19, %c0_20], %17 {strides = array<i32>} : memref<16x32xf32, #tpu.memory_space<vmem>>, vector<16x32xf32>,
    return
  }
  func.func @transform_0(%arg0: i32, %arg1: i32) -> (i32, i32) {
    %c0_i32 = arith.constant 0 : i32
    %c0_i32_0 = arith.constant 0 : i32
    return %arg0, %c0_i32 : i32, i32
  }
  func.func @transform_1(%arg0: i32, %arg1: i32) -> (i32, i32) {
    %c0_i32 = arith.constant 0 : i32
    %c0_i32_0 = arith.constant 0 : i32
    return %c0_i32, %arg1 : i32, i32
  }
  func.func @transform_2(%arg0: i32, %arg1: i32) -> (i32, i32) {
    %c0_i32 = arith.constant 0 : i32
    %c0_i32_0 = arith.constant 0 : i32
    return %c0_i32, %arg1 : i32, i32
  }
  func.func @transform_3(%arg0: i32, %arg1: i32) -> (i32, i32) {
    %c0_i32 = arith.constant 0 : i32
    %c0_i32_0 = arith.constant 0 : i32
    return %c0_i32, %arg1 : i32, i32
  }
  func.func @transform_4(%arg0: i32, %arg1: i32) -> (i32, i32) {
    %c0_i32 = arith.constant 0 : i32
    %c0_i32_0 = arith.constant 0 : i32
    return %c0_i32, %arg1 : i32, i32
  }
  func.func @transform_5(%arg0: i32, %arg1: i32) -> (i32, i32) {
    %c0_i32 = arith.constant 0 : i32
    %c0_i32_0 = arith.constant 0 : i32
    return %c0_i32, %arg1 : i32, i32
  }
  func.func @transform_6(%arg0: i32, %arg1: i32) -> (i32, i32) {
    %c0_i32 = arith.constant 0 : i32
    %c0_i32_0 = arith.constant 0 : i32
    return %c0_i32, %arg1 : i32, i32
  }
  func.func @transform_7(%arg0: i32, %arg1: i32) -> (i32, i32) {
    %c0_i32 = arith.constant 0 : i32
    return %arg0, %arg1 : i32, i32
  }
  func.func @transform_8(%arg0: i32, %arg1: i32) -> (i32, i32) {
    %c0_i32 = arith.constant 0 : i32
    return %arg0, %arg1 : i32, i32
  }
  func.func @transform_9(%arg0: i32, %arg1: i32) -> (i32, i32) {
    %c0_i32 = arith.constant 0 : i32
    return %arg0, %arg1 : i32, i32
  }
}

module attributes {stable_mosaic.version = 11 : i64} {
  func.func @kernel(%arg0: i32, %arg1: i32, %arg2: i32, %arg3: memref<1x8x32xf32, #tpu.memory_space<vmem>>, %arg4: memref<1x8x32xf32, #tpu.memory_space<vmem>>, %arg5: memref<1x8x32xf32, #tpu.memory_space<vmem>>, %arg6: memref<1x8x32xf32, #tpu.memory_space<vmem>>, %arg7: memref<1x8x1xf32, #tpu.memory_space<vmem>>, %arg8: memref<1x8x1xf32, #tpu.memory_space<vmem>>, %arg9: memref<1x8x32xf32, #tpu.memory_space<vmem>>) attributes {dimension_semantics = [#tpu.dimension_semantics<parallel>, #tpu.dimension_semantics<parallel>, #tpu.dimension_semantics<arbitrary>], iteration_bounds = array<i64: 2, 1, 1>, scalar_prefetch = 0 : i64, scratch_operands = 3 : i64, tpu.core_type = #tpu.core_type<tc>, window_params = [{transform_indices = @transform_0, window_bounds = array<i64: 1, 8, 32>}, {transform_indices = @transform_1, window_bounds = array<i64: 1, 8, 32>}, {transform_indices = @transform_2, window_bounds = array<i64: 1, 8, 32>}, {transform_indices = @transform_3, window_bounds = array<i64: 1, 8, 32>}]} {
    %c0 = arith.constant 0 : index
    %c0_0 = arith.constant 0 : index
    %c0_1 = arith.constant 0 : index
    %0 = vector.load %arg3[%c0, %c0_0, %c0_1] : memref<1x8x32xf32, #tpu.memory_space<vmem>>, vector<1x8x32xf32>
    %c0_2 = arith.constant 0 : index
    %c0_3 = arith.constant 0 : index
    %c0_4 = arith.constant 0 : index
    %1 = vector.load %arg4[%c0_2, %c0_3, %c0_4] : memref<1x8x32xf32, #tpu.memory_space<vmem>>, vector<1x8x32xf32>
    %c0_5 = arith.constant 0 : index
    %c0_6 = arith.constant 0 : index
    %c0_7 = arith.constant 0 : index
    %2 = vector.load %arg5[%c0_5, %c0_6, %c0_7] : memref<1x8x32xf32, #tpu.memory_space<vmem>>, vector<1x8x32xf32>
    "tpu.trace_start"() <{level = 10 : i32, message = "bqd,bkd->bqk"}> : () -> ()
    %cst = arith.constant dense<0.000000e+00> : vector<1x8x8xf32>
    %3 = tpu.matmul %0, %1, %cst {dimension_numbers = #tpu.dot_dimension_numbers<[2], [2], [1], [1], [0, 0, 0, 1, 1, 1], [0], [0]>} : vector<1x8x32xf32>, vector<1x8x32xf32>, vector<1x8x8xf32> -> vector<1x8x8xf32>
    "tpu.trace_stop"() : () -> ()
    %cst_8 = arith.constant dense<0xFF800000> : vector<1x8xf32>
    %4 = vector.multi_reduction <maximumf>, %3, %cst_8 [2] : vector<1x8x8xf32> to vector<1x8xf32>
    %5 = vector.shape_cast %4 : vector<1x8xf32> to vector<1x8x1xf32>
    %c0_i32 = arith.constant 0 : i32
    %6 = arith.cmpi eq, %arg2, %c0_i32 : i32
    %7 = arith.extui %6 : i1 to i32
    %c0_i32_9 = arith.constant 0 : i32
    %8 = arith.cmpi ne, %7, %c0_i32_9 : i32
    scf.if %8 {
      %15 = vector.broadcast %5 : vector<1x8x1xf32> to vector<1x8x8xf32>
      %16 = arith.subf %3, %15 : vector<1x8x8xf32>
      %17 = math.exp %16 : vector<1x8x8xf32>
      %c0_14 = arith.constant 0 : index
      %c0_15 = arith.constant 0 : index
      %c0_16 = arith.constant 0 : index
      %18 = vector.load %arg7[%c0_14, %c0_15, %c0_16] : memref<1x8x1xf32, #tpu.memory_space<vmem>>, vector<1x8x1xf32>
      tpu.vector_store %arg7[%c0_14, %c0_15, %c0_16], %5 {strides = array<i32>} : memref<1x8x1xf32, #tpu.memory_space<vmem>>, vector<1x8x1xf32>,
      %cst_17 = arith.constant dense<0.000000e+00> : vector<1x8xf32>
      %19 = vector.multi_reduction <add>, %17, %cst_17 [2] : vector<1x8x8xf32> to vector<1x8xf32>
      %20 = vector.shape_cast %19 : vector<1x8xf32> to vector<1x8x1xf32>
      %c0_18 = arith.constant 0 : index
      %c0_19 = arith.constant 0 : index
      %c0_20 = arith.constant 0 : index
      %21 = vector.load %arg8[%c0_18, %c0_19, %c0_20] : memref<1x8x1xf32, #tpu.memory_space<vmem>>, vector<1x8x1xf32>
      tpu.vector_store %arg8[%c0_18, %c0_19, %c0_20], %20 {strides = array<i32>} : memref<1x8x1xf32, #tpu.memory_space<vmem>>, vector<1x8x1xf32>,
      "tpu.trace_start"() <{level = 10 : i32, message = "bqk,bkd->bqd"}> : () -> ()
      %cst_21 = arith.constant dense<0.000000e+00> : vector<1x8x32xf32>
      %22 = tpu.matmul %17, %2, %cst_21 {dimension_numbers = #tpu.dot_dimension_numbers<[2], [1], [1], [2], [0, 0, 0, 1, 1, 2], [0], [0]>} : vector<1x8x8xf32>, vector<1x8x32xf32>, vector<1x8x32xf32> -> vector<1x8x32xf32>
      "tpu.trace_stop"() : () -> ()
      %c0_22 = arith.constant 0 : index
      %c0_23 = arith.constant 0 : index
      %c0_24 = arith.constant 0 : index
      %23 = vector.load %arg9[%c0_22, %c0_23, %c0_24] : memref<1x8x32xf32, #tpu.memory_space<vmem>>, vector<1x8x32xf32>
      tpu.vector_store %arg9[%c0_22, %c0_23, %c0_24], %22 {strides = array<i32>} : memref<1x8x32xf32, #tpu.memory_space<vmem>>, vector<1x8x32xf32>,
    } else {
    }
    %c0_i32_10 = arith.constant 0 : i32
    %9 = arith.cmpi ne, %arg2, %c0_i32_10 : i32
    %10 = arith.extui %9 : i1 to i32
    %c0_i32_11 = arith.constant 0 : i32
    %11 = arith.cmpi ne, %10, %c0_i32_11 : i32
    scf.if %11 {
      %c0_14 = arith.constant 0 : index
      %c0_15 = arith.constant 0 : index
      %c0_16 = arith.constant 0 : index
      %15 = vector.load %arg7[%c0_14, %c0_15, %c0_16] : memref<1x8x1xf32, #tpu.memory_space<vmem>>, vector<1x8x1xf32>
      %16 = arith.maximumf %15, %5 : vector<1x8x1xf32>
      %17 = arith.subf %15, %16 : vector<1x8x1xf32>
      %18 = math.exp %17 : vector<1x8x1xf32>
      %19 = vector.broadcast %16 : vector<1x8x1xf32> to vector<1x8x8xf32>
      %20 = arith.subf %3, %19 : vector<1x8x8xf32>
      %21 = math.exp %20 : vector<1x8x8xf32>
      %c0_17 = arith.constant 0 : index
      %c0_18 = arith.constant 0 : index
      %c0_19 = arith.constant 0 : index
      %22 = vector.load %arg7[%c0_17, %c0_18, %c0_19] : memref<1x8x1xf32, #tpu.memory_space<vmem>>, vector<1x8x1xf32>
      tpu.vector_store %arg7[%c0_17, %c0_18, %c0_19], %16 {strides = array<i32>} : memref<1x8x1xf32, #tpu.memory_space<vmem>>, vector<1x8x1xf32>,
      %c0_20 = arith.constant 0 : index
      %c0_21 = arith.constant 0 : index
      %c0_22 = arith.constant 0 : index
      %23 = vector.load %arg8[%c0_20, %c0_21, %c0_22] : memref<1x8x1xf32, #tpu.memory_space<vmem>>, vector<1x8x1xf32>
      %24 = arith.mulf %18, %23 : vector<1x8x1xf32>
      %cst_23 = arith.constant dense<0.000000e+00> : vector<1x8xf32>
      %25 = vector.multi_reduction <add>, %21, %cst_23 [2] : vector<1x8x8xf32> to vector<1x8xf32>
      %26 = vector.shape_cast %25 : vector<1x8xf32> to vector<1x8x1xf32>
      %27 = arith.addf %24, %26 : vector<1x8x1xf32>
      %c0_24 = arith.constant 0 : index
      %c0_25 = arith.constant 0 : index
      %c0_26 = arith.constant 0 : index
      %28 = vector.load %arg8[%c0_24, %c0_25, %c0_26] : memref<1x8x1xf32, #tpu.memory_space<vmem>>, vector<1x8x1xf32>
      tpu.vector_store %arg8[%c0_24, %c0_25, %c0_26], %27 {strides = array<i32>} : memref<1x8x1xf32, #tpu.memory_space<vmem>>, vector<1x8x1xf32>,
      %c0_27 = arith.constant 0 : index
      %c0_28 = arith.constant 0 : index
      %c0_29 = arith.constant 0 : index
      %29 = vector.load %arg9[%c0_27, %c0_28, %c0_29] : memref<1x8x32xf32, #tpu.memory_space<vmem>>, vector<1x8x32xf32>
      %30 = vector.broadcast %18 : vector<1x8x1xf32> to vector<1x8x32xf32>
      %31 = arith.mulf %30, %29 : vector<1x8x32xf32>
      "tpu.trace_start"() <{level = 10 : i32, message = "bqk,bkd->bqd"}> : () -> ()
      %cst_30 = arith.constant dense<0.000000e+00> : vector<1x8x32xf32>
      %32 = tpu.matmul %21, %2, %cst_30 {dimension_numbers = #tpu.dot_dimension_numbers<[2], [1], [1], [2], [0, 0, 0, 1, 1, 2], [0], [0]>} : vector<1x8x8xf32>, vector<1x8x32xf32>, vector<1x8x32xf32> -> vector<1x8x32xf32>
      "tpu.trace_stop"() : () -> ()
      %33 = arith.addf %31, %32 : vector<1x8x32xf32>
      %c0_31 = arith.constant 0 : index
      %c0_32 = arith.constant 0 : index
      %c0_33 = arith.constant 0 : index
      %34 = vector.load %arg9[%c0_31, %c0_32, %c0_33] : memref<1x8x32xf32, #tpu.memory_space<vmem>>, vector<1x8x32xf32>
      tpu.vector_store %arg9[%c0_31, %c0_32, %c0_33], %33 {strides = array<i32>} : memref<1x8x32xf32, #tpu.memory_space<vmem>>, vector<1x8x32xf32>,
    } else {
    }
    %c0_i32_12 = arith.constant 0 : i32
    %12 = arith.cmpi eq, %arg2, %c0_i32_12 : i32
    %13 = arith.extui %12 : i1 to i32
    %c0_i32_13 = arith.constant 0 : i32
    %14 = arith.cmpi ne, %13, %c0_i32_13 : i32
    scf.if %14 {
      %c0_14 = arith.constant 0 : index
      %c0_15 = arith.constant 0 : index
      %c0_16 = arith.constant 0 : index
      %15 = vector.load %arg8[%c0_14, %c0_15, %c0_16] : memref<1x8x1xf32, #tpu.memory_space<vmem>>, vector<1x8x1xf32>
      %16 = tpu.reciprocal %15 : vector<1x8x1xf32> -> vector<1x8x1xf32>
      %c0_17 = arith.constant 0 : index
      %c0_18 = arith.constant 0 : index
      %c0_19 = arith.constant 0 : index
      %17 = vector.load %arg9[%c0_17, %c0_18, %c0_19] : memref<1x8x32xf32, #tpu.memory_space<vmem>>, vector<1x8x32xf32>
      %18 = vector.broadcast %16 : vector<1x8x1xf32> to vector<1x8x32xf32>
      %19 = arith.mulf %17, %18 : vector<1x8x32xf32>
      %c0_20 = arith.constant 0 : index
      %c0_21 = arith.constant 0 : index
      %c0_22 = arith.constant 0 : index
      %20 = vector.load %arg6[%c0_20, %c0_21, %c0_22] : memref<1x8x32xf32, #tpu.memory_space<vmem>>, vector<1x8x32xf32>
      tpu.vector_store %arg6[%c0_20, %c0_21, %c0_22], %19 {strides = array<i32>} : memref<1x8x32xf32, #tpu.memory_space<vmem>>, vector<1x8x32xf32>,
    } else {
    }
    return
  }
  func.func @transform_0(%arg0: i32, %arg1: i32, %arg2: i32) -> (i32, i32, i32) {
    %c0_i32 = arith.constant 0 : i32
    %c0_i32_0 = arith.constant 0 : i32
    return %arg0, %arg1, %c0_i32 : i32, i32, i32
  }
  func.func @transform_1(%arg0: i32, %arg1: i32, %arg2: i32) -> (i32, i32, i32) {
    %c0_i32 = arith.constant 0 : i32
    %c0_i32_0 = arith.constant 0 : i32
    return %arg0, %arg2, %c0_i32 : i32, i32, i32
  }
  func.func @transform_2(%arg0: i32, %arg1: i32, %arg2: i32) -> (i32, i32, i32) {
    %c0_i32 = arith.constant 0 : i32
    %c0_i32_0 = arith.constant 0 : i32
    return %arg0, %arg2, %c0_i32 : i32, i32, i32
  }
  func.func @transform_3(%arg0: i32, %arg1: i32, %arg2: i32) -> (i32, i32, i32) {
    %c0_i32 = arith.constant 0 : i32
    %c0_i32_0 = arith.constant 0 : i32
    return %arg0, %arg1, %c0_i32 : i32, i32, i32
  }
}

</mosaic_0001>

<bundles_post_ra>
// kernel: self_attention.3
= control target key start
LH: loop header
LB: loop body
LE: loop exit
PB: predicated region body
PF: predicated region fallthrough
CT: control target
= control target key end

     0   :  { %8 = vsyncpa [#allocation6], 0  ;;  %s817_s0 = inlined_call_operand.vmem [shape: f32[2,8,32], index: 0, kind: input, shape index: {}]   ;;  %s818_s1 = inlined_call_operand.vmem [shape: f32[2,8,32], index: 1, kind: input, shape index: {}]   ;;  %s819_s2 = inlined_call_operand.vmem [shape: f32[2,8,32], index: 2, kind: input, shape index: {}]   ;;  %s820_s3 = inlined_call_operand.hbm [shape: f32[2,8,32], index: 3, kind: output, shape index: {}]  }
   0x1   :  { %10 = vsyncpa [#allocation6 + $0x1], 0  ;;  %s710_s12 = smov 0   ;;  %s712_s13 = smov 0  }
   0x2   :  { %s714_s14 = smov 0   ;;  %s716_s15 = smov 0  }
   0x3   :  { %s718_s16 = smov 0   ;;  %s720_s17 = smov 0  }
   0x4 LB: > { %s530_s18 = sadd.s32 4294967295, %s687_s17   ;;  %s531_s19 = sadd.s32 4294967294, %s687_s17   ;;  %s687_s17 = sphi %s720_s17, %s16_s17   ;;  %s683_s16 = sphi %s718_s16, %s827_s16   ;;  %s679_s15 = sphi %s716_s15, %s826_s15   ;;  %s675_s14 = sphi %s714_s14, %s825_s14   ;;  %s671_s13 = sphi %s712_s13, %s824_s13   ;;  %s667_s12 = sphi %s710_s12, %s823_s12  }
   0x5   : > { %s35_s20 = sadd.s32 1, %s683_s16  ;;  %s128_s21 = sadd.s32 1, %s675_s14 }
   0x6   : > { %p37_p0 = scmp.ge.s32.totalorder %s35_s20, 2  ;;  %p138_p1 = scmp.ne.s32.totalorder %s675_s14, %s671_s13 }
   0x7   : > { %p139_p2 = scmp.eq.s32.totalorder %s530_s18, 1  ;;  %p144_p3 = scmp.ne.s32.totalorder %s671_s13, %s667_s12 }
   0x8   : > { %s829_s20 = smov (%p37_p0, %s35_s20), 0  ;;  %p145_p5 = scmp.eq.s32.totalorder %s531_s19, 1 }
   0x9   : > { %p750_p4 = por %p139_p2, %p138_p1  ;;  %s123_s23 = ssub.s32 %s683_s16, %s829_s20 }
   0xa   : > { %p534_p6 = scmp.ge.s32.totalorder %s687_s17, 1  ;;  %p126_p7 = scmp.eq.s32.totalorder %s123_s23, 0 }
   0xb   : > { %p757_p8 = por %p145_p5, %p144_p3  ;;  %p193_p9 = scmp.lt.s32.totalorder %s687_s17, 3 }
   0xc   : > { %s763_s25 = scalar_select %p126_p7, %s675_s14, %s128_s21  }
   0xd   : > { %p194_p10 = pnand %p534_p6, %p193_p9 }
   0xe   : > { %p233_p11 = scmp.lt.s32.totalorder (!%p194_p10), %s679_s15, 1  ;;  %s230_s10 = sand.u32 (!%p194_p10), 1, %s671_s13  }
   0xf   : > { %197 = sbr.rel (%p194_p10) target bundleno = 544 (0x220), region = 32  ;;  %s535_s11 = sshll.u32 (!%p194_p10), %s230_s10, 3 }
  0x10   : > { %s544_s18 = sshll.u32 (!%p194_p10), %s679_s15, 3  ;;  %s410_s29 = scalar_lea.sflag (!%p194_p10), [#allocation6], %s230_s10 }
  0x11   : > { %s421_s23 = scalar_lea.hbm (!%p194_p10), %s820_s3, %s544_s18 }
  0x12   : > { %s425_s28 = sshll.u32 (!%p194_p10), %s421_s23, 4  ;;  %s426_s28 = int_to_ptr.hbm [resolvable:$true] %s425_s28 }
  0x14   : > { %s234_s26 = scalar_select %p233_p11, %s679_s15, 1  ;;  %vm257_vm0 = vcmask 261120   ;;  %vm284_vm1 = vcmask 64512   ;;  %vm295_vm2 = vcmask 7168   ;;  %v689_v10 = vmov 0  }
  0x15   : > { %603 = vset.pattern.permute.xlu1 %v689_v10  ;;  %604 = vset.pattern.permute.xlu0 %v689_v10 }
  0x16   : > { %s536_s27 = sshll.u32 %s234_s26, 3  ;;  %s232_s26 = scalar_lea.vmem [#allocation5], %s535_s11 }
  0x17   : > { %s246_s30 = scalar_lea.vmem %s818_s1, %s536_s27  ;;  %s239_s6 = scalar_lea.vmem %s817_s0, %s536_s27 }
  0x18   : > { %v255_v0 = vld [vmem:[%s246_s30] sm:$0xff]  ;;  %s253_s9 = scalar_lea.vmem %s819_s2, %s536_s27  ;;  %s423_s27 = sshll.u32 %s232_s26, 4  ;;  %s424_s27 = int_to_ptr.vmem [resolvable:$true] %s423_s27 }
  0x19   : > { %539 = vmatpush.xpose.msk.msra.mxu0 %vm257_vm0, %v255_v0  ;;  %v254_v1 = vld [vmem:[%s239_s6] sm:$0xff]  ;;  %s623_s30 = sshra.s32 %s426_s28, 4  ;;  %s629_s6 = scalar_lea.hbm %s820_s3, 16  ;;  %s624_s30 = int_to_ptr.hbm [resolvable:$true] %s623_s30 }
  0x1a   : > { %v256_v4 = vld [vmem:[%s253_s9] sm:$0xff]  ;;  %s625_s4 = scalar_lea.hbm %s624_s30, 8  ;;  %p630_p1 = scmp.lt.s32.totalorder %s624_s30, %s820_s3 }
  0x1b   : > { %319 = vmatpush.msra.mxu1 %v256_v4  ;;  %p626_p12 = scmp.ne.s32.totalorder %s624_s30, %s625_s4  ;;  %p631_p2 = scmp.lt.s32.totalorder %s629_s6, %s625_s4 }
  0x1c   : > { %540 = vmatmul.msk.f32.vlgmr.msra.gmra.mxu0 %vm257_vm0, %v254_v1 }
  0x1d   : > { %p627_p13 = pnand %p626_p12, %p750_p4  ;;  %p632_p3 = por %p631_p2, %p630_p1 }
  0x1f   : > { %p628_p0 = pneg %p627_p13 }
  0x21   : > { %p633_p5 = pnand %p632_p3, %p628_p0 }
  0x99   : > { %v281_v2 = vpop.f32.mrf.mxu0 }
  0x9a   : > { %v285_v3 = vsel %vm284_vm1, %v281_v2, -inf }
  0x9b   : > { %286 = vmax.xlane.f32.xlu0 %v285_v3 }
 0x10e   : > { %v287_v5 = vpop.xlane.xlu0 %286 }
 0x10f   : > { %v292_v6 = vsub.f32 %v281_v2, %v287_v5 }
 0x111   : > { %v293_v7 = vmul.f32 1.442695, %v292_v6 }
 0x113   : > { %605 = vpow2.f32 %v293_v7 }
 0x119   : > { %v606_v8 = vpop.eup %605 }
 0x11a   : > { %541 = vmatmul.msk.f32.vlgmr.msra.gmra.mxu1 %vm284_vm1, %v606_v8  ;;  %v297_v9 = vsel %vm284_vm1, %v606_v8, 0.0 }
 0x11b   : > { %298 = vadd.xlane.f32.xlu0 %v297_v9 }
 0x18e   : > { %v299_v11 = vpop.xlane.xlu0 %298 }
 0x18f   : > { %300 = vst.msk [vmem:[#allocation3] sm:$0xff] %vm295_vm2, %v299_v11 }
 0x196   : > { %v386_v12 = vld [vmem:[#allocation3] sm:$0xff] }
 0x197   : > { %v321_v13 = vpop.f32.mrf.mxu1  ;;  %607 = vrcp.f32 %v386_v12  ;;  %v398_v17 = vand.u32 2147483648, %v386_v12  ;;  %v396_v19 = vand.u32 2147483647, %v386_v12  ;;  %vm392_vm4 = vweird.f32 %v386_v12 }
 0x198   : > { %324 = vst.msk [vmem:[#allocation4] sm:$0xff] %vm257_vm0, %v321_v13 }
 0x199   : > { %v399_v21 = vor.u32 1.1754944e-38, %v398_v17  ;;  %vm397_vm6 = vcmp.eq.f32.partialorder %v396_v19, 8.507059e+37 }
 0x19d   : > { %v608_v14 = vpop.eup %607 }
 0x19e   : > { %v388_v15 = vmul.f32 %v608_v14, %v386_v12  ;;  %vm393_vm3 = vweird.f32 %v608_v14 }
 0x19f   : > { %vm394_vm5 = vmor %vm392_vm4, %vm393_vm3  ;;  %v401_v24 = vld [vmem:[#allocation4] sm:$0xff] }
 0x1a0   : > { %v389_v16 = vsub.f32 1.0, %v388_v15 }
 0x1a2   : > { %v390_v18 = vmul.f32 %v608_v14, %v389_v16 }
 0x1a4   : > { %v391_v20 = vadd.f32 %v608_v14, %v390_v18 }
 0x1a6   : > { %v395_v22 = vsel %vm394_vm5, %v608_v14, %v391_v20 }
 0x1a7   : > { %v400_v23 = vsel %vm397_vm6, %v399_v21, %v395_v22 }
 0x1a8   : > { %404 = vperm.xlu1 %603, %v400_v23  }
 0x21a   : > { %v405_v25 = vpop.permute.xlu1 %404 }
 0x21b   : > { %v407_v26 = vmul.f32 %v405_v25, %v401_v24 }
 0x21d   : > { %408 = vst.msk [vmem:[%s232_s26] sm:$0xff] %vm257_vm0, %v407_v26 }
 0x21e   : > { %636 = shalt.err (!%p633_p5)
}
 0x21f   : > { %547 = dma.vmem_to_hbm [thread:$0]  (%p750_p4), %s424_s27, 128, %s426_s28, %s410_s29  }
 0x220 PF: > { %p553_p6 = scmp.ge.s32.totalorder %s687_s17, 2  ;;  %s437_s9 = sand.u32 1, %s667_s12  }
 0x221   : > { %s438_s10 = scalar_lea.sflag [#allocation6], %s437_s9 }
 0x222   : > { %p550_p7 = pnand %p553_p6, %p757_p8 }
 0x224   : > { %p551_p9 = pneg %p550_p7 }
 0x226   : > { %662 = dma.done.wait (%p551_p9), %s438_s10, 128  }
 0x227   : > { %664 = vsyncadd (%p551_p9), %s438_s10, 4294967168  ;;  %s16_s17 = sadd.s32 1, %s687_s17   ;;  %s823_s12 = smov %s671_s13 }
 0x228   : > { %p13_p10 = scmp.ge.s32.totalorder %s16_s17, 4   ;;  %s824_s13 = smov %s675_s14 }
 0x229   : > { %s825_s14 = smov %s763_s25  ;;  %s826_s15 = smov %s683_s16 }
 0x22a   : > { %s827_s16 = smov %s829_s20  ;;  %15 = sbr.rel (!%p13_p10) target bundleno = 4 (0x4), region = 85 }
 0x22f   :  { %444 = vsyncpa [#allocation6], 1 }
 0x230   :  { %446 = vsyncpa [#allocation6 + $0x1], 1 }

// kernel: self_attention.2
= control target key start
LH: loop header
LB: loop body
LE: loop exit
PB: predicated region body
PF: predicated region fallthrough
CT: control target
= control target key end

     0   :  { %15 = vsyncpa [#allocation3], 0  ;;  %s443_s0 = inlined_call_operand.hbm [shape: f32[16,32], index: 0, kind: input, shape index: {}]   ;;  %s444_s1 = inlined_call_operand.hbm [shape: f32[32,32], index: 1, kind: input, shape index: {}]   ;;  %s445_s2 = inlined_call_operand.hbm [shape: f32[32,32], index: 2, kind: input, shape index: {}]   ;;  %s446_s3 = inlined_call_operand.hbm [shape: f32[32,32], index: 3, kind: input, shape index: {}]   ;;  %s447_s4 = inlined_call_operand.vmem [shape: f32[1,32], index: 4, kind: input, shape index: {}]   ;;  %s448_s5 = inlined_call_operand.vmem [shape: f32[1,32], index: 5, kind: input, shape index: {}]   ;;  %s449_s6 = inlined_call_operand.vmem [shape: f32[1,32], index: 6, kind: input, shape index: {}]   ;;  %s450_s7 = inlined_call_operand.vmem [shape: f32[16,32], index: 7, kind: output, shape index: {0}]   ;;  %s451_s8 = inlined_call_operand.vmem [shape: f32[16,32], index: 8, kind: output, shape index: {1}]   ;;  %s452_s9 = inlined_call_operand.vmem [shape: f32[16,32], index: 9, kind: output, shape index: {2}]  }
   0x1   :  { %16 = vsyncpa [#allocation5], 0 }
   0x2   :  { %17 = vsyncpa [#allocation8], 0  ;;  %s35_s11 = sshll.u32 %s444_s1, 4  ;;  %s336_s12 = smov [#allocation4]   ;;  %s36_s11 = int_to_ptr.hbm [resolvable:$true] %s35_s11 }
   0x3   :  { %s37_s13 = sshll.u32 %s336_s12, 4  ;;  %s22_s16 = sshll.u32 %s443_s0, 4  ;;  %s38_s13 = int_to_ptr.vmem [resolvable:$true] %s37_s13  ;;  %s23_s16 = int_to_ptr.hbm [resolvable:$true] %s22_s16 }
   0x4   :  { %s337_s17 = smov 128   ;;  %s338_s18 = smov 8  }
   0x5   :  { %43 = dma.hbm_to_vmem [thread:$0]  %s36_s11, 512, %s38_s13, [#allocation5], %s337_s17, %s337_s17, %s338_s18  }
   0x6   :  { %s339_s19 = smov [#allocation2]   ;;  %s48_s23 = sshll.u32 %s445_s2, 4  ;;  %s49_s23 = int_to_ptr.hbm [resolvable:$true] %s48_s23 }
   0x7   :  { %s24_s20 = sshll.u32 %s339_s19, 4  ;;  %s61_s25 = sshll.u32 %s446_s3, 4  ;;  %s25_s20 = int_to_ptr.vmem [resolvable:$true] %s24_s20  ;;  %s62_s25 = int_to_ptr.hbm [resolvable:$true] %s61_s25 }
   0x8   :  { %30 = dma.hbm_to_vmem [thread:$0]  %s23_s16, 256, %s25_s20, [#allocation3], %s337_s17, %s337_s17, %s338_s18  }
   0x9   :  { %s340_s26 = smov [#allocation6]   ;;  %s341_s0 = smov [#allocation7]  }
   0xa   :  { %s50_s27 = sshll.u32 %s340_s26, 4  ;;  %s63_s28 = sshll.u32 %s341_s0, 4  ;;  %s51_s27 = int_to_ptr.vmem [resolvable:$true] %s50_s27  ;;  %s64_s28 = int_to_ptr.vmem [resolvable:$true] %s63_s28 }
   0xb   :  { %56 = dma.hbm_to_vmem [thread:$0]  %s49_s23, 512, %s51_s27, [#allocation5], %s337_s17, %s337_s17, %s338_s18  }
   0xc   :  { %69 = dma.hbm_to_vmem [thread:$0]  %s62_s25, 512, %s64_s28, [#allocation8], %s337_s17, %s337_s17, %s338_s18  }
   0xd   :  { %330 = dma.done.wait [#allocation3], 256  }
   0xe   :  { %331 = vsyncadd [#allocation3], 4294967040 }
   0xf   :  { %332 = dma.done.wait [#allocation5], 1024  }
  0x10   :  { %333 = vsyncadd [#allocation5], 4294966272 }
  0x11   :  { %334 = dma.done.wait [#allocation8], 512  }
  0x12   :  { %335 = vsyncadd [#allocation8], 4294966784  ;;  %v170_v0 = vld [vmem:[#allocation7 + $0x18] sm:$0xff]  ;;  %v169_v1 = vld [vmem:[#allocation7 + $0x10] sm:$0xff]  ;;  %vm102_vm0 = vcmask 261120  }
  0x13   :  { %187 = vmatpush.msra.mxu2 %v170_v0  ;;  %v168_v2 = vld [vmem:[#allocation7 + $0x8] sm:$0xff]  ;;  %v137_v3 = vld [vmem:[#allocation6 + $0x18] sm:$0xff]  ;;  %v136_v5 = vld [vmem:[#allocation6 + $0x10] sm:$0xff] }
  0x14   :  { %154 = vmatpush.msra.mxu1 %v137_v3  ;;  %v97_v4 = vld [vmem:[#allocation4 + $0x18] sm:$0xff]  ;;  %v96_v6 = vld [vmem:[#allocation4 + $0x10] sm:$0xff]  ;;  %v167_v7 = vld [vmem:[#allocation7] sm:$0xff] }
  0x15   :  { %188 = vmatpush.msra.mxu2 %v169_v1  ;;  %221 = vmatpush.msra.mxu3 %v97_v4  ;;  %v135_v8 = vld [vmem:[#allocation6 + $0x8] sm:$0xff]  ;;  %v92_v9 = vld [vmem:[#allocation2] sm:$0xff]  ;;  %v134_v11 = vld [vmem:[#allocation6] sm:$0xff] }
  0x16   :  { %155 = vmatpush.msra.mxu1 %v136_v5  ;;  %v95_v10 = vld [vmem:[#allocation4 + $0x8] sm:$0xff]  ;;  %121 = vmatpush.msra.mxu0 %v97_v4  ;;  %v94_v12 = vld [vmem:[#allocation4] sm:$0xff]  ;;  %v93_v13 = vld [vmem:[#allocation2 + $0x8] sm:$0xff] }
  0x17   :  { %189 = vmatpush.msra.mxu2 %v168_v2  ;;  %222 = vmatpush.msra.mxu3 %v96_v6  ;;  %v231_v14 = vld [vmem:[%s448_s5] ss:$0 sm:$0xff] }
  0x18   :  { %156 = vmatpush.msra.mxu1 %v135_v8  ;;  %122 = vmatpush.msra.mxu0 %v96_v6  ;;  %v233_v17 = vld [vmem:[%s447_s4] ss:$0 sm:$0xff] }
  0x19   :  { %190 = vmatpush.msra.mxu2 %v167_v7  ;;  %223 = vmatpush.msra.mxu3 %v95_v10  ;;  %v232_v18 = vld [vmem:[%s449_s6] ss:$0 sm:$0xff] }
  0x1a   :  { %219 = vmatmul.msk.f32.vlgmr.msra.gmra.mxu2 %vm102_vm0, %v92_v9  ;;  %157 = vmatpush.msra.mxu1 %v134_v11 }
  0x1b   :  { %217 = vmatmul.msk.f32.vlgmr.msra.gmra.mxu1 %vm102_vm0, %v92_v9  ;;  %224 = vmatpush.msra.mxu3 %v94_v12 }
  0x1c   :  { %216 = vmatmul.msk.f32.vlgmr.msra.gmra.mxu3 %vm102_vm0, %v93_v13  ;;  %123 = vmatpush.msra.mxu0 %v95_v10 }
  0x1e   :  { %124 = vmatpush.msra.mxu0 %v94_v12 }
  0x1f   :  { %215 = vmatmul.msk.f32.vlgmr.msra.gmra.mxu0 %vm102_vm0, %v92_v9 }
  0x22   :  { %220 = vmatmul.msk.f32.gmra.mxu2 %vm102_vm0, %v93_v13 }
  0x23   :  { %218 = vmatmul.msk.f32.gmra.mxu1 %vm102_vm0, %v93_v13 }
  0x98   :  { %v159_v15 = vpop.f32.mrf.mxu1 }
  0x99   :  { %v160_v16 = vadd.f32 %v231_v14, %v159_v15 }
  0x9b   :  { %165 = vst.msk [vmem:[%s451_s8] sm:$0xff] %vm102_vm0, %v160_v16 }
  0x9c   :  { %v126_v19 = vpop.f32.mrf.mxu0 }
  0x9d   :  { %v192_v20 = vpop.f32.mrf.mxu2  ;;  %v127_v21 = vadd.f32 %v233_v17, %v126_v19 }
  0x9e   :  { %v193_v22 = vadd.f32 %v232_v18, %v192_v20 }
  0x9f   :  { %132 = vst.msk [vmem:[%s450_s7] sm:$0xff] %vm102_vm0, %v127_v21  ;;  %v129_v23 = vpop.f32.mrf.mxu3 }
  0xa0   :  { %198 = vst.msk [vmem:[%s452_s9] sm:$0xff] %vm102_vm0, %v193_v22  ;;  %v130_v24 = vadd.f32 %v233_v17, %v129_v23  ;;  %v162_v25 = vpop.f32.mrf.mxu1 }
  0xa1   :  { %v163_v26 = vadd.f32 %v231_v14, %v162_v25 }
  0xa2   :  { %133 = vst.msk [vmem:[%s450_s7 + $0x8] sm:$0xff] %vm102_vm0, %v130_v24 }
  0xa3   :  { %166 = vst.msk [vmem:[%s451_s8 + $0x8] sm:$0xff] %vm102_vm0, %v163_v26 }
  0xa5   :  { %v195_v27 = vpop.f32.mrf.mxu2 }
  0xa6   :  { %v196_v28 = vadd.f32 %v232_v18, %v195_v27 }
  0xa8   :  { %199 = vst.msk [vmem:[%s452_s9 + $0x8] sm:$0xff] %vm102_vm0, %v196_v28 }
  0xa9   :  { %212 = vsyncpa [#allocation3], 1 }
  0xaa   :  { %213 = vsyncpa [#allocation5], 1 }
  0xab   :  { %214 = vsyncpa [#allocation8], 1 }

</bundles_post_ra>
